<compile_context>
chip_gen: v7x
topology: tpu7x:2x2x1
jax: 0.10.0
libtpu: 0.0.40
codegen_flags: <defaults>
</compile_context>

<pallas_src>
import math

import jax
import jax.numpy as jnp
from jax.experimental import pallas as pl
from jax.experimental.pallas import tpu as pltpu


_NEG_SLOPE = 0.2
_VMEM_LIMIT_CACHE = None


def _vmem_limit_bytes():
    """Generation-aware scoped-VMEM request: ~85% of physical per-core VMEM."""
    global _VMEM_LIMIT_CACHE
    if _VMEM_LIMIT_CACHE is None:
        cap = 64 * 1024 * 1024                    # conservative fallback (= v7x physical)
        try:
            info = pltpu.get_tpu_info()
            cap = int(getattr(info, "vmem_capacity_bytes", cap))
        except Exception:
            pass
        _VMEM_LIMIT_CACHE = int(cap * 0.85)       # headroom for Mosaic scratch / buffers
    return _VMEM_LIMIT_CACHE


def _point_tile(n, max_tile):
    """Full axis if small; else the largest multiple of 128 <= max_tile dividing n.

    tile_n is the last dim of the lane-dense outputs, so when tiling it must be
    a multiple of 128 (or the full axis)."""
    if n <= max_tile:
        return n
    t = (max_tile // 128) * 128
    while t >= 128:
        if n % t == 0:
            return t
        t -= 128
    return n


# ----------------------------------------------------------------------------
# Kernel 1: fused knn (gram + iterative top-k) + layer-0 projections
# ----------------------------------------------------------------------------
def _make_knn_project_kernel(k):
    def kernel(xrow_ref, xall_ref, xx_ref, wtop_ref, wdiff_ref,
               idx_ref, ytop_ref, ydiff_ref):
        xi = xrow_ref[0]            # (tile_n, C)  bf16 query rows
        xa = xall_ref[0]            # (C, N)       bf16 all points (points on lanes)
        xx = xx_ref[0]              # (1, N)       f32 hoisted squared norms

        gram = jnp.dot(xi, xa, preferred_element_type=jnp.float32)   # (tile_n, N) f32

        # Neighbor score = -||xi - xj||^2 up to a per-row constant (dropped:
        # only a per-row top-k consumes it).  Comparison path stays in f32.
        score = 2.0 * gram - xx

        n_all = score.shape[-1]
        col_f = jax.lax.broadcasted_iota(jnp.int32, score.shape, 1).astype(jnp.float32)
        d = score
        cols = []
        for _ in range(k):          # iterative top-k on the VPU (k is small)
            m = jnp.max(d, axis=-1, keepdims=True)
            sel = jnp.min(jnp.where(d == m, col_f, float(n_all)),
                          axis=-1, keepdims=True)       # lowest argmax, (tile_n, 1)
            cols.append(sel)
            d = jnp.where(col_f == sel, -jnp.inf, d)
        idx_ref[0] = jnp.concatenate(cols, axis=1).astype(jnp.int32)   # (tile_n, k)

        # layer-0 projections (bf16 MXU, f32 accumulation, stored bf16)
        ytop_ref[0] = jnp.dot(xi, wtop_ref[...],
                              preferred_element_type=jnp.float32).astype(ytop_ref.dtype)
        ydiff_ref[0] = jnp.dot(xi, wdiff_ref[...],
                               preferred_element_type=jnp.float32).astype(ydiff_ref.dtype)
    return kernel


def knn_project(x_nc, x_cn, xx, w_top, w_diff, k):
    """x_nc: (B,N,C) bf16, x_cn: (B,C,N) bf16, xx: (B,1,N) f32.
    Returns (idx (B,N,k) i32, y_top (B,N,C0) bf16, y_diff (B,N,C0) bf16)."""
    B, N, C = x_nc.shape
    C0 = w_top.shape[1]

    # Size the point tile from the VMEM budget: ~4 live f32 (tile_n, N) arrays
    # (score / masked copy / iota / temps) dominate the in-kernel working set.
    budget = _vmem_limit_bytes() // 2
    max_tile = max(128, min(512, budget // (16 * N)))
    tn = _point_tile(N, max_tile)
    # NOTE(v7x megacore): B * (N // tn) grid steps get split across both cores.

    return pl.pallas_call(
        _make_knn_project_kernel(k),
        out_shape=(
            jax.ShapeDtypeStruct((B, N, k), jnp.int32),
            jax.ShapeDtypeStruct((B, N, C0), jnp.bfloat16),
            jax.ShapeDtypeStruct((B, N, C0), jnp.bfloat16),
        ),
        grid=(B, N // tn),
        in_specs=[
            pl.BlockSpec((1, tn, C), lambda b, i: (b, i, 0)),   # query rows
            pl.BlockSpec((1, C, N), lambda b, i: (b, 0, 0)),    # all points (resident)
            pl.BlockSpec((1, 1, N), lambda b, i: (b, 0, 0)),    # hoisted norms
            pl.BlockSpec(w_top.shape, lambda b, i: (0, 0)),
            pl.BlockSpec(w_diff.shape, lambda b, i: (0, 0)),
        ],
        out_specs=(
            pl.BlockSpec((1, tn, k), lambda b, i: (b, i, 0)),
            pl.BlockSpec((1, tn, C0), lambda b, i: (b, i, 0)),
            pl.BlockSpec((1, tn, C0), lambda b, i: (b, i, 0)),
        ),
        compiler_params=pltpu.CompilerParams(
            dimension_semantics=("parallel", "parallel"),
            vmem_limit_bytes=_vmem_limit_bytes()),
    )(x_nc, x_cn, xx, w_top, w_diff)


# ----------------------------------------------------------------------------
# Kernel 2: edge-conv chain on pre-gathered projected neighbors + max over k
#           (lane-dense transposed output -> result is already (B, C, N))
# ----------------------------------------------------------------------------
def _make_edgeconv_kernel(num_layers, negative_slope=_NEG_SLOPE):
    def kernel(g_ref, yd_ref, *rest):
        out_ref = rest[-1]
        params = rest[:-1]

        g = g_ref[0]                       # (K, tile_n, C0)  bf16, k-major
        yd = yd_ref[0]                     # (tile_n, C0)     bf16
        K, tn, c0 = g.shape

        # layer-0 pre-activation: f0[k, n] = y_top[idx[n, k]] + y_diff[n]
        f = (g.astype(jnp.float32) + yd.astype(jnp.float32)[None, :, :])
        f = f.reshape(K * tn, c0)

        # layer 0: folded BN + LeakyReLU (its 1x1 conv was the projection)
        f = f * params[0][...] + params[1][...]
        f = jnp.maximum(f, negative_slope * f)

        # layers 1..L-1: 1x1 conv (bf16 MXU, f32 accum) + folded BN + LeakyReLU
        p = 2
        for _ in range(1, num_layers):
            w = params[p][...]
            scale = params[p + 1][...]
            shift = params[p + 2][...]
            p += 3
            f = jnp.dot(f.astype(w.dtype), w, preferred_element_type=jnp.float32)
            f = f * scale + shift
            f = jnp.maximum(f, negative_slope * f)

        c_out = f.shape[-1]
        # max over k: k-major layout -> cheap leading-axis max
        fm = jnp.max(f.reshape(K, tn, c_out), axis=0)          # (tile_n, c_out)
        # lane-dense store: points on lanes -> output already in (B, C, N)
        out_ref[0] = fm.T.astype(out_ref.dtype)                # (c_out, tile_n)

    return kernel


def edge_conv_block(gathered, y_diff, layer_params):
    """gathered: (B, K, N, C0) bf16 gathered projected neighbors (k-major).
       y_diff:   (B, N, C0) bf16 center-point projection.
       Returns (B, C_out, N) f32 (PyTorch layout)."""
    B, K, N, C0 = gathered.shape
    tn = _point_tile(N, 512)
    c_out = layer_params[-1][0].shape[1]

    in_specs = [
        pl.BlockSpec((1, K, tn, C0), lambda b, i: (b, 0, i, 0)),
        pl.BlockSpec((1, tn, C0), lambda b, i: (b, i, 0)),
        pl.BlockSpec(layer_params[0][1].shape, lambda b, i: (0, 0)),  # scale0
        pl.BlockSpec(layer_params[0][2].shape, lambda b, i: (0, 0)),  # shift0
    ]
    flat_params = [layer_params[0][1], layer_params[0][2]]
    for (w, scale, shift) in layer_params[1:]:
        wb = w.astype(jnp.bfloat16)
        for p in (wb, scale, shift):
            flat_params.append(p)
            in_specs.append(pl.BlockSpec(p.shape, lambda b, i: (0, 0)))

    kernel = _make_edgeconv_kernel(len(layer_params))
    return pl.pallas_call(
        kernel,
        out_shape=jax.ShapeDtypeStruct((B, c_out, N), jnp.float32),
        grid=(B, N // tn),
        in_specs=in_specs,
        out_specs=pl.BlockSpec((1, c_out, tn), lambda b, i: (b, 0, i)),
        compiler_params=pltpu.CompilerParams(
            dimension_semantics=("parallel", "parallel"),
            vmem_limit_bytes=_vmem_limit_bytes()),
    )(gathered, y_diff, *flat_params)


# ----------------------------------------------------------------------------
# Full forward: DGCNNAggregation.forward
# ----------------------------------------------------------------------------
def dgcnn_aggregation(x, params, nodes, k):
    """x: (B, C, N) -- PyTorch layout. Returns (x_out, results), both (B, C, N)."""
    del nodes  # layer shapes are carried by `params`
    x_cn = x.astype(jnp.float32)                               # (B, C, N)
    results = []
    for layer_params in params:
        c_in = x_cn.shape[1]
        w0 = layer_params[0][0]                                # (2*Cin, C0) f32
        w_top = w0[:c_in].astype(jnp.bfloat16)                 # neighbor part
        w_diff = (w0[c_in:] - w0[:c_in]).astype(jnp.bfloat16)  # center part

        xx = jnp.sum(x_cn * x_cn, axis=1, keepdims=True)       # (B, 1, N) f32
        x_nc = jnp.swapaxes(x_cn, 1, 2).astype(jnp.bfloat16)   # (B, N, C) bf16
        x_cn_b = x_cn.astype(jnp.bfloat16)                     # (B, C, N) bf16

        idx, y_top, y_diff = knn_project(x_nc, x_cn_b, xx, w_top, w_diff, k)

        # kNN gather of the *projected* rows (tiny int32 idx, bf16 rows, k-major).
        idx_km = jnp.swapaxes(idx, 1, 2)                                   # (B, k, N)
        gathered = jax.vmap(lambda yt, ix: jnp.take(yt, ix, axis=0))(y_top, idx_km)
        # gathered: (B, k, N, C0) bf16
        # TODO(synk): move this row gather inside edge_conv (resident y_top) to
        #             remove the k-x HBM intermediate entirely.

        x_cn = edge_conv_block(gathered, y_diff, layer_params)  # (B, C_out, N) f32
        results.append(x_cn)
    return results[-1], results


# ----------------------------------------------------------------------------
# Deterministic parameter init (Conv2d 1x1 no-bias + BatchNorm2d folded)
# ----------------------------------------------------------------------------
def init_params(nodes, key):
    eps = 1e-5
    params = []
    for node_list in nodes:
        assert len(node_list) >= 2
        layer_params = []
        for l, (cin, cout) in enumerate(zip(node_list[:-1], node_list[1:])):
            if l == 0:
                cin = cin * 2                    # graph feature doubles channels
            key, kw, kg, kb = jax.random.split(key, 4)
            w = jax.random.normal(kw, (cin, cout), jnp.float32) / math.sqrt(cin)
            gamma = 1.0 + 0.1 * jax.random.normal(kg, (cout,), jnp.float32)
            beta = 0.1 * jax.random.normal(kb, (cout,), jnp.float32)
            running_mean = jnp.zeros((cout,), jnp.float32)
            running_var = jnp.ones((cout,), jnp.float32)
            scale = gamma / jnp.sqrt(running_var + eps)
            shift = beta - running_mean * scale
            layer_params.append((w, scale.reshape(1, cout), shift.reshape(1, cout)))
        params.append(layer_params)
    return params


# ----------------------------------------------------------------------------
# Pure-JAX reference mirroring the kernel arithmetic (bf16 matmuls, f32 accum)
# ----------------------------------------------------------------------------
def _reference_forward(x, params, k):
    x_cn = x.astype(jnp.float32)
    results = []
    for layer_params in params:
        c_in = x_cn.shape[1]
        x_nc = jnp.swapaxes(x_cn, 1, 2)
        xb = x_nc.astype(jnp.bfloat16)
        gram = jnp.einsum("bnc,bmc->bnm", xb, xb,
                          preferred_element_type=jnp.float32)
        xx = jnp.sum(x_cn * x_cn, axis=1)                      # (B, N)
        score = 2.0 * gram - xx[:, None, :]                    # row-constant dropped
        idx = jax.lax.top_k(score, k)[1]                       # (B, N, k)

        w0 = layer_params[0][0]
        w_top = w0[:c_in].astype(jnp.bfloat16)
        w_diff = (w0[c_in:] - w0[:c_in]).astype(jnp.bfloat16)
        y_top = jnp.einsum("bnc,cd->bnd", xb, w_top,
                           preferred_element_type=jnp.float32).astype(jnp.bfloat16)
        y_diff = jnp.einsum("bnc,cd->bnd", xb, w_diff,
                            preferred_element_type=jnp.float32).astype(jnp.bfloat16)

        gath = jax.vmap(lambda yt, ix: jnp.take(yt, ix, axis=0))(y_top, idx)
        f = gath.astype(jnp.float32) + y_diff[:, :, None, :].astype(jnp.float32)
        f = f * layer_params[0][1] + layer_params[0][2]
        f = jnp.maximum(f, _NEG_SLOPE * f)
        for (w, scale, shift) in layer_params[1:]:
            f = jnp.einsum("bnkc,cd->bnkd", f.astype(jnp.bfloat16),
                           w.astype(jnp.bfloat16),
                           preferred_element_type=jnp.float32)
            f = f * scale + shift
            f = jnp.maximum(f, _NEG_SLOPE * f)
        out_nc = jnp.max(f, axis=2)                            # (B, N, c_out)
        x_cn = jnp.swapaxes(out_nc, 1, 2)                      # (B, c_out, N)
        results.append(x_cn)
    return results[-1], results


if __name__ == "__main__":
    key = jax.random.PRNGKey(0)
    kx, kp = jax.random.split(key)

    # Small shapes: batch=2, in-channels=4, points=16, knn k=4
    nodes = [[4, 16, 32], [32, 32]]
    k = 4
    B, C, N = 2, 4, 16

    x = jax.random.normal(kx, (B, C, N), jnp.float32)
    params = init_params(nodes, kp)

    x_out, results = dgcnn_aggregation(x, params, nodes, k)
    x_out = jax.block_until_ready(x_out)
    results = [jax.block_until_ready(r) for r in results]

    assert x_out.shape == (B, nodes[-1][-1], N)
    assert results[0].shape == (B, nodes[0][-1], N)
    assert results[1].shape == (B, nodes[1][-1], N)
    assert all(bool(jnp.all(jnp.isfinite(r))) for r in results)

    ref_out, ref_results = _reference_forward(x, params, k)
    for got, want in zip(results, ref_results):
        assert got.shape == want.shape
        assert bool(jnp.allclose(got, want, rtol=2e-2, atol=2e-2)), (
            float(jnp.max(jnp.abs(got - want))))

    print("KERNEL_OK")
</pallas_src>

<mosaic_0001>
module attributes {stable_mosaic.version = 11 : i64} {
  func.func @kernel(%arg0: i32, %arg1: i32, %arg2: memref<1x16x4xbf16, #tpu.memory_space<vmem>>, %arg3: memref<1x4x16xbf16, #tpu.memory_space<vmem>>, %arg4: memref<1x1x16xf32, #tpu.memory_space<vmem>>, %arg5: memref<4x16xbf16, #tpu.memory_space<vmem>>, %arg6: memref<4x16xbf16, #tpu.memory_space<vmem>>, %arg7: memref<1x16x4xi32, #tpu.memory_space<vmem>>, %arg8: memref<1x16x16xbf16, #tpu.memory_space<vmem>>, %arg9: memref<1x16x16xbf16, #tpu.memory_space<vmem>>) attributes {dimension_semantics = [#tpu.dimension_semantics<parallel>, #tpu.dimension_semantics<parallel>], iteration_bounds = array<i64: 2, 1>, scalar_prefetch = 0 : i64, scratch_operands = 0 : i64, tpu.core_type = #tpu.core_type<tc>, window_params = [{transform_indices = @transform_0, window_bounds = array<i64: 1, 16, 4>}, {transform_indices = @transform_1, window_bounds = array<i64: 1, 4, 16>}, {transform_indices = @transform_2, window_bounds = array<i64: 1, 1, 16>}, {pipeline_mode = #tpu.pipeline_mode<synchronous>, transform_indices = @transform_3, window_bounds = array<i64: 4, 16>}, {pipeline_mode = #tpu.pipeline_mode<synchronous>, transform_indices = @transform_4, window_bounds = array<i64: 4, 16>}, {transform_indices = @transform_5, window_bounds = array<i64: 1, 16, 4>}, {transform_indices = @transform_6, window_bounds = array<i64: 1, 16, 16>}, {transform_indices = @transform_7, window_bounds = array<i64: 1, 16, 16>}]} {
    %c0 = arith.constant 0 : index
    %c0_0 = arith.constant 0 : index
    %c0_1 = arith.constant 0 : index
    %0 = vector.load %arg2[%c0, %c0_0, %c0_1] : memref<1x16x4xbf16, #tpu.memory_space<vmem>>, vector<1x16x4xbf16>
    %1 = vector.shape_cast %0 : vector<1x16x4xbf16> to vector<16x4xbf16>
    %c0_2 = arith.constant 0 : index
    %c0_3 = arith.constant 0 : index
    %c0_4 = arith.constant 0 : index
    %2 = vector.load %arg3[%c0_2, %c0_3, %c0_4] : memref<1x4x16xbf16, #tpu.memory_space<vmem>>, vector<1x4x16xbf16>
    %3 = vector.shape_cast %2 : vector<1x4x16xbf16> to vector<4x16xbf16>
    %c0_5 = arith.constant 0 : index
    %c0_6 = arith.constant 0 : index
    %c0_7 = arith.constant 0 : index
    %4 = vector.load %arg4[%c0_5, %c0_6, %c0_7] : memref<1x1x16xf32, #tpu.memory_space<vmem>>, vector<1x1x16xf32>
    %5 = vector.shape_cast %4 : vector<1x1x16xf32> to vector<1x16xf32>
    %cst = arith.constant dense<0.000000e+00> : vector<16x16xf32>
    %6 = tpu.matmul %1, %3, %cst {dimension_numbers = #tpu.dot_dimension_numbers<[1], [0], [0], [1], [0, 0, 1, 1], [], []>} : vector<16x4xbf16>, vector<4x16xbf16>, vector<16x16xf32> -> vector<16x16xf32>
    %cst_8 = arith.constant 2.000000e+00 : f32
    %7 = vector.broadcast %cst_8 : f32 to vector<16x16xf32>
    %8 = arith.mulf %7, %6 : vector<16x16xf32>
    %9 = vector.broadcast %5 : vector<1x16xf32> to vector<16x16xf32>
    %10 = arith.subf %8, %9 : vector<16x16xf32>
    %11 = tpu.iota {dimensions = array<i32: 1>} : vector<16x16xi32>
    %12 = arith.sitofp %11 : vector<16x16xi32> to vector<16x16xf32>
    %cst_9 = arith.constant dense<0xFF800000> : vector<16xf32>
    %13 = vector.multi_reduction <maximumf>, %10, %cst_9 [1] : vector<16x16xf32> to vector<16xf32>
    %14 = vector.shape_cast %13 : vector<16xf32> to vector<16x1xf32>
    %15 = vector.broadcast %14 : vector<16x1xf32> to vector<16x16xf32>
    %16 = arith.cmpf oeq, %10, %15 : vector<16x16xf32>
    %cst_10 = arith.constant 1.600000e+01 : f32
    %17 = vector.broadcast %cst_10 : f32 to vector<16x16xf32>
    %18 = arith.select %16, %12, %17 : vector<16x16xi1>, vector<16x16xf32>
    %cst_11 = arith.constant dense<0x7F800000> : vector<16xf32>
    %19 = vector.multi_reduction <minimumf>, %18, %cst_11 [1] : vector<16x16xf32> to vector<16xf32>
    %20 = vector.shape_cast %19 : vector<16xf32> to vector<16x1xf32>
    %21 = vector.broadcast %20 : vector<16x1xf32> to vector<16x16xf32>
    %22 = arith.cmpf oeq, %12, %21 : vector<16x16xf32>
    %cst_12 = arith.constant 0xFF800000 : f32
    %23 = vector.broadcast %cst_12 : f32 to vector<16x16xf32>
    %24 = arith.select %22, %23, %10 : vector<16x16xi1>, vector<16x16xf32>
    %cst_13 = arith.constant dense<0xFF800000> : vector<16xf32>
    %25 = vector.multi_reduction <maximumf>, %24, %cst_13 [1] : vector<16x16xf32> to vector<16xf32>
    %26 = vector.shape_cast %25 : vector<16xf32> to vector<16x1xf32>
    %27 = vector.broadcast %26 : vector<16x1xf32> to vector<16x16xf32>
    %28 = arith.cmpf oeq, %24, %27 : vector<16x16xf32>
    %cst_14 = arith.constant 1.600000e+01 : f32
    %29 = vector.broadcast %cst_14 : f32 to vector<16x16xf32>
    %30 = arith.select %28, %12, %29 : vector<16x16xi1>, vector<16x16xf32>
    %cst_15 = arith.constant dense<0x7F800000> : vector<16xf32>
    %31 = vector.multi_reduction <minimumf>, %30, %cst_15 [1] : vector<16x16xf32> to vector<16xf32>
    %32 = vector.shape_cast %31 : vector<16xf32> to vector<16x1xf32>
    %33 = vector.broadcast %32 : vector<16x1xf32> to vector<16x16xf32>
    %34 = arith.cmpf oeq, %12, %33 : vector<16x16xf32>
    %cst_16 = arith.constant 0xFF800000 : f32
    %35 = vector.broadcast %cst_16 : f32 to vector<16x16xf32>
    %36 = arith.select %34, %35, %24 : vector<16x16xi1>, vector<16x16xf32>
    %cst_17 = arith.constant dense<0xFF800000> : vector<16xf32>
    %37 = vector.multi_reduction <maximumf>, %36, %cst_17 [1] : vector<16x16xf32> to vector<16xf32>
    %38 = vector.shape_cast %37 : vector<16xf32> to vector<16x1xf32>
    %39 = vector.broadcast %38 : vector<16x1xf32> to vector<16x16xf32>
    %40 = arith.cmpf oeq, %36, %39 : vector<16x16xf32>
    %cst_18 = arith.constant 1.600000e+01 : f32
    %41 = vector.broadcast %cst_18 : f32 to vector<16x16xf32>
    %42 = arith.select %40, %12, %41 : vector<16x16xi1>, vector<16x16xf32>
    %cst_19 = arith.constant dense<0x7F800000> : vector<16xf32>
    %43 = vector.multi_reduction <minimumf>, %42, %cst_19 [1] : vector<16x16xf32> to vector<16xf32>
    %44 = vector.shape_cast %43 : vector<16xf32> to vector<16x1xf32>
    %45 = vector.broadcast %44 : vector<16x1xf32> to vector<16x16xf32>
    %46 = arith.cmpf oeq, %12, %45 : vector<16x16xf32>
    %cst_20 = arith.constant 0xFF800000 : f32
    %47 = vector.broadcast %cst_20 : f32 to vector<16x16xf32>
    %48 = arith.select %46, %47, %36 : vector<16x16xi1>, vector<16x16xf32>
    %cst_21 = arith.constant dense<0xFF800000> : vector<16xf32>
    %49 = vector.multi_reduction <maximumf>, %48, %cst_21 [1] : vector<16x16xf32> to vector<16xf32>
    %50 = vector.shape_cast %49 : vector<16xf32> to vector<16x1xf32>
    %51 = vector.broadcast %50 : vector<16x1xf32> to vector<16x16xf32>
    %52 = arith.cmpf oeq, %48, %51 : vector<16x16xf32>
    %cst_22 = arith.constant 1.600000e+01 : f32
    %53 = vector.broadcast %cst_22 : f32 to vector<16x16xf32>
    %54 = arith.select %52, %12, %53 : vector<16x16xi1>, vector<16x16xf32>
    %cst_23 = arith.constant dense<0x7F800000> : vector<16xf32>
    %55 = vector.multi_reduction <minimumf>, %54, %cst_23 [1] : vector<16x16xf32> to vector<16xf32>
    %56 = vector.shape_cast %55 : vector<16xf32> to vector<16x1xf32>
    %57 = tpu.concatenate %20, %32, %44, %56 in 1 : vector<16x1xf32>, vector<16x1xf32>, vector<16x1xf32>, vector<16x1xf32> -> vector<16x4xf32>
    %58 = arith.fptosi %57 : vector<16x4xf32> to vector<16x4xi32>
    %c0_24 = arith.constant 0 : index
    %c0_25 = arith.constant 0 : index
    %c0_26 = arith.constant 0 : index
    %59 = vector.load %arg7[%c0_24, %c0_25, %c0_26] : memref<1x16x4xi32, #tpu.memory_space<vmem>>, vector<1x16x4xi32>
    %60 = vector.shape_cast %59 : vector<1x16x4xi32> to vector<16x4xi32>
    %61 = vector.shape_cast %58 : vector<16x4xi32> to vector<1x16x4xi32>
    tpu.vector_store %arg7[%c0_24, %c0_25, %c0_26], %61 {strides = array<i32>} : memref<1x16x4xi32, #tpu.memory_space<vmem>>, vector<1x16x4xi32>,
    %c0_27 = arith.constant 0 : index
    %c0_28 = arith.constant 0 : index
    %62 = vector.load %arg5[%c0_27, %c0_28] : memref<4x16xbf16, #tpu.memory_space<vmem>>, vector<4x16xbf16>
    %cst_29 = arith.constant dense<0.000000e+00> : vector<16x16xf32>
    %63 = tpu.matmul %1, %62, %cst_29 {dimension_numbers = #tpu.dot_dimension_numbers<[1], [0], [0], [1], [0, 0, 1, 1], [], []>} : vector<16x4xbf16>, vector<4x16xbf16>, vector<16x16xf32> -> vector<16x16xf32>
    %64 = arith.truncf %63 : vector<16x16xf32> to vector<16x16xbf16>
    %c0_30 = arith.constant 0 : index
    %c0_31 = arith.constant 0 : index
    %c0_32 = arith.constant 0 : index
    %65 = vector.load %arg8[%c0_30, %c0_31, %c0_32] : memref<1x16x16xbf16, #tpu.memory_space<vmem>>, vector<1x16x16xbf16>
    %66 = vector.shape_cast %65 : vector<1x16x16xbf16> to vector<16x16xbf16>
    %67 = vector.shape_cast %64 : vector<16x16xbf16> to vector<1x16x16xbf16>
    tpu.vector_store %arg8[%c0_30, %c0_31, %c0_32], %67 {strides = array<i32>} : memref<1x16x16xbf16, #tpu.memory_space<vmem>>, vector<1x16x16xbf16>,
    %c0_33 = arith.constant 0 : index
    %c0_34 = arith.constant 0 : index
    %68 = vector.load %arg6[%c0_33, %c0_34] : memref<4x16xbf16, #tpu.memory_space<vmem>>, vector<4x16xbf16>
    %cst_35 = arith.constant dense<0.000000e+00> : vector<16x16xf32>
    %69 = tpu.matmul %1, %68, %cst_35 {dimension_numbers = #tpu.dot_dimension_numbers<[1], [0], [0], [1], [0, 0, 1, 1], [], []>} : vector<16x4xbf16>, vector<4x16xbf16>, vector<16x16xf32> -> vector<16x16xf32>
    %70 = arith.truncf %69 : vector<16x16xf32> to vector<16x16xbf16>
    %c0_36 = arith.constant 0 : index
    %c0_37 = arith.constant 0 : index
    %c0_38 = arith.constant 0 : index
    %71 = vector.load %arg9[%c0_36, %c0_37, %c0_38] : memref<1x16x16xbf16, #tpu.memory_space<vmem>>, vector<1x16x16xbf16>
    %72 = vector.shape_cast %71 : vector<1x16x16xbf16> to vector<16x16xbf16>
    %73 = vector.shape_cast %70 : vector<16x16xbf16> to vector<1x16x16xbf16>
    tpu.vector_store %arg9[%c0_36, %c0_37, %c0_38], %73 {strides = array<i32>} : memref<1x16x16xbf16, #tpu.memory_space<vmem>>, vector<1x16x16xbf16>,
    return
  }
  func.func @transform_0(%arg0: i32, %arg1: i32) -> (i32, i32, i32) {
    %c0_i32 = arith.constant 0 : i32
    %c0_i32_0 = arith.constant 0 : i32
    return %arg0, %arg1, %c0_i32 : i32, i32, i32
  }
  func.func @transform_1(%arg0: i32, %arg1: i32) -> (i32, i32, i32) {
    %c0_i32 = arith.constant 0 : i32
    %c0_i32_0 = arith.constant 0 : i32
    %c0_i32_1 = arith.constant 0 : i32
    return %arg0, %c0_i32, %c0_i32_0 : i32, i32, i32
  }
  func.func @transform_2(%arg0: i32, %arg1: i32) -> (i32, i32, i32) {
    %c0_i32 = arith.constant 0 : i32
    %c0_i32_0 = arith.constant 0 : i32
    %c0_i32_1 = arith.constant 0 : i32
    return %arg0, %c0_i32, %c0_i32_0 : i32, i32, i32
  }
  func.func @transform_3(%arg0: i32, %arg1: i32) -> (i32, i32) {
    %c0_i32 = arith.constant 0 : i32
    %c0_i32_0 = arith.constant 0 : i32
    %c0_i32_1 = arith.constant 0 : i32
    return %c0_i32, %c0_i32_0 : i32, i32
  }
  func.func @transform_4(%arg0: i32, %arg1: i32) -> (i32, i32) {
    %c0_i32 = arith.constant 0 : i32
    %c0_i32_0 = arith.constant 0 : i32
    %c0_i32_1 = arith.constant 0 : i32
    return %c0_i32, %c0_i32_0 : i32, i32
  }
  func.func @transform_5(%arg0: i32, %arg1: i32) -> (i32, i32, i32) {
    %c0_i32 = arith.constant 0 : i32
    %c0_i32_0 = arith.constant 0 : i32
    return %arg0, %arg1, %c0_i32 : i32, i32, i32
  }
  func.func @transform_6(%arg0: i32, %arg1: i32) -> (i32, i32, i32) {
    %c0_i32 = arith.constant 0 : i32
    %c0_i32_0 = arith.constant 0 : i32
    return %arg0, %arg1, %c0_i32 : i32, i32, i32
  }
  func.func @transform_7(%arg0: i32, %arg1: i32) -> (i32, i32, i32) {
    %c0_i32 = arith.constant 0 : i32
    %c0_i32_0 = arith.constant 0 : i32
    return %arg0, %arg1, %c0_i32 : i32, i32, i32
  }
}

</mosaic_0001>

<bundles_post_ra>
// kernel: tpu_custom_call.1
= control target key start
LH: loop header
LB: loop body
LE: loop exit
PB: predicated region body
PF: predicated region fallthrough
CT: control target
= control target key end

     0   :  { %s1413_s0 = inlined_call_operand.vmem [shape: bf16[2,16,4], index: 0, kind: input, shape index: {}]   ;;  %s1414_s1 = inlined_call_operand.vmem [shape: bf16[2,4,16], index: 1, kind: input, shape index: {}]   ;;  %s1415_s2 = inlined_call_operand.vmem [shape: f32[2,1,16], index: 2, kind: input, shape index: {}]   ;;  %s1416_s3 = inlined_call_operand.vmem [shape: bf16[4,16], index: 3, kind: input, shape index: {}]   ;;  %s1417_s4 = inlined_call_operand.vmem [shape: bf16[4,16], index: 4, kind: input, shape index: {}]   ;;  %s1418_s5 = inlined_call_operand.vmem [shape: s32[2,16,4], index: 5, kind: output, shape index: {0}]   ;;  %s1419_s6 = inlined_call_operand.hbm [shape: bf16[2,16,16], index: 6, kind: output, shape index: {1}]   ;;  %s1420_s7 = inlined_call_operand.hbm [shape: bf16[2,16,16], index: 7, kind: output, shape index: {2}]  }
   0x1   :  { %1422 = sst [smem:[#allocation8_spill]] %s1413_s0 }
   0x2   :  { %1423 = sst [smem:[#allocation9_spill]] %s1414_s1 }
   0x3   :  { %1424 = sst [smem:[#allocation10_spill]] %s1415_s2 }
   0x4   :  { %1425 = sst [smem:[#allocation11_spill]] %s1416_s3 }
   0x5   :  { %13 = vsyncpa [#allocation3], 0 }
   0x6   :  { %15 = vsyncpa [#allocation3 + $0x1], 0 }
   0x7   :  { %16 = vsyncpa [#allocation5], 0 }
   0x8   :  { %18 = vsyncpa [#allocation5 + $0x1], 0  ;;  %s1161_s24 = smov 0   ;;  %s1163_s25 = smov 0  }
   0x9   :  { %s1165_s26 = smov 0   ;;  %s1167_s27 = smov 0  }
   0xa   :  { %s1169_s28 = smov 0   ;;  %s1171_s29 = smov 0  }
   0xb LB: > { %s873_s30 = sadd.s32 4294967295, %s1113_s29   ;;  %s874_s8 = sadd.s32 4294967294, %s1113_s29   ;;  %s1113_s29 = sphi %s1171_s29, %s24_s29   ;;  %s1109_s28 = sphi %s1169_s28, %s1438_s28   ;;  %s1105_s27 = sphi %s1167_s27, %s1437_s27   ;;  %s1101_s26 = sphi %s1165_s26, %s1436_s26   ;;  %s1097_s25 = sphi %s1163_s25, %s1435_s25   ;;  %s1093_s24 = sphi %s1161_s24, %s1434_s24  }
   0xc   : > { %s36_s9 = sadd.s32 1, %s1109_s28  ;;  %s195_s10 = sadd.s32 1, %s1101_s26 }
   0xd   : > { %p38_p0 = scmp.ge.s32.totalorder %s36_s9, 2  ;;  %p205_p1 = scmp.ne.s32.totalorder %s1101_s26, %s1097_s25 }
   0xe   : > { %p206_p2 = scmp.eq.s32.totalorder %s873_s30, 1  ;;  %p211_p3 = scmp.ne.s32.totalorder %s1097_s25, %s1093_s24 }
   0xf   : > { %s1440_s9 = smov (%p38_p0, %s36_s9), 0  ;;  %p212_p5 = scmp.eq.s32.totalorder %s874_s8, 1 }
  0x10   : > { %p1201_p4 = por %p206_p2, %p205_p1  ;;  %s190_s12 = ssub.s32 %s1109_s28, %s1440_s9 }
  0x11   : > { %p877_p6 = scmp.ge.s32.totalorder %s1113_s29, 1  ;;  %p193_p7 = scmp.eq.s32.totalorder %s190_s12, 0 }
  0x12   : > { %p1208_p8 = por %p212_p5, %p211_p3  ;;  %p290_p9 = scmp.lt.s32.totalorder %s1113_s29, 3 }
  0x13   : > { %s1214_s14 = scalar_select %p193_p7, %s1101_s26, %s195_s10  }
  0x14   : > { %p291_p10 = pnand %p877_p6, %p290_p9 }
  0x15   : > { %p348_p11 = scmp.lt.s32.totalorder (!%p291_p10), %s1105_s27, 1  ;;  %v1115_v0 = vmov (!%p291_p10), 0.0   ;;  %vm1116_vm0 = vmmov (!%p291_p10), 0   ;;  %vm390_vm1 = vcmask (!%p291_p10), 1041408   ;;  %s1428_s1 = sld [smem:[#allocation9_spill]] (!%p291_p10)  ;;  %vm386_vm2 = vcmask (!%p291_p10), 31744  }
  0x16   : > { %294 = sbr.rel (%p291_p10) target bundleno = 1422 (0x58e), region = 40  ;;  %916 = vmatprep.subr.bf16.mxu0 (!%p291_p10), %v1115_v0  ;;  %918 = vmatprep.mubr.msk.bf16.mxu0 (!%p291_p10), %vm1116_vm0, %v1115_v0  ;;  %s1429_s0 = sld [smem:[#allocation8_spill]] (!%p291_p10)  ;;  %vm448_vm3 = vcmask (!%p291_p10), 130048   ;;  %v445_v15 = vlaneseq (!%p291_p10)  ;;  %v594_v48 = vld [vmem:[%s1417_s4] sm:$0x3] (!%p291_p10) }
  0x17   : > { %922 = vmatprep.subr.bf16.mxu1 (!%p291_p10), %v1115_v0  ;;  %924 = vmatprep.mubr.msk.bf16.mxu1 (!%p291_p10), %vm1116_vm0, %v1115_v0  ;;  %s1430_s2 = sld [smem:[#allocation10_spill]] (!%p291_p10)  ;;  %s1431_s3 = sld [smem:[#allocation11_spill]] (!%p291_p10)  ;;  %v596_v50 = vsel (!%p291_p10), %vm390_vm1, %v594_v48, 0 }
  0x18   : > { %v446_v16 = vand.u32 (!%p291_p10), 127, %v445_v15  ;;  %s1303_s19 = sand.u32 (!%p291_p10), 1, %s1097_s25   ;;  %s1421_s8 = sshll.u32 (!%p291_p10), %s1105_s27, 7 }
  0x1a   : > { %v1242_v17 = vcvt.s32.f32 (!%p291_p10), %v446_v16 }
  0x1d   : > { %s1219_s15 = scalar_select %p348_p11, %s1105_s27, 1  ;;  %v538_v49 = vld [vmem:[%s1431_s3] sm:$0x3] }
  0x1e   : > { %v540_v51 = vsel %vm390_vm1, %v538_v49, 0 }
  0x1f   : > { %s882_s16 = sshll.u32 %s1219_s15, 1  ;;  %s902_s17 = sshll.u32 %s1219_s15, 3  ;;  %923 = vmatpush3.bf16.msra.mxu1 %v540_v51 }
  0x20   : > { %s360_s20 = scalar_lea.vmem %s1428_s1, %s882_s16  ;;  %s355_s23 = scalar_lea.vmem %s1429_s0, %s902_s17 }
  0x21   : > { %v379_v1 = vld [vmem:[%s360_s20] sm:$0x3]  ;;  %s363_s10 = scalar_lea.vmem %s1430_s2, %s1219_s15  ;;  %s878_s20 = sshll.u32 %s1303_s19, 3 }
  0x22   : > { %v392_v2 = vsel %vm390_vm1, %v379_v1, 0  ;;  %v1231_v3 = vld [vmem:[%s355_s23] sm:$0xff]   ;;  %s339_s21 = scalar_lea.vmem [#allocation2], %s878_s20  ;;  %s346_s23 = scalar_lea.vmem [#allocation4], %s878_s20 }
  0x23   : > { %917 = vmatpush3.bf16.msra.mxu0 %v392_v2  ;;  %v887_v4 = vld [vmem:[%s363_s10] ss:$0 sm:$0xff]  ;;  %925 = vmatmul.mubr.msk.bf16.vlgmr.msra.gmra.mrb[0].mxu1 %vm386_vm2, %v1231_v3  ;;  %s683_s22 = sshll.u32 %s339_s21, 4  ;;  %s701_s30 = sshll.u32 %s346_s23, 4  ;;  %s1306_s22 = int_to_ptr.vmem [resolvable:$true] %s683_s22  ;;  %s1308_s30 = int_to_ptr.vmem [resolvable:$true] %s701_s30 }
  0x24   : > { %928 = vmatprep.subr.bf16.mxu0 %v1115_v0  ;;  %s1316_s16 = scalar_lea.hbm %s1419_s6, %s1421_s8  ;;  %s1003_s18 = scalar_lea.vmem %s1306_s22, 128 }
  0x25   : > { %p1004_p12 = scmp.ne.s32.totalorder %s1306_s22, %s1003_s18  ;;  %s1117_s20 = smov [#allocation2]  }
  0x26   : > { %919 = vmatmul.mubr.msk.bf16.vlgmr.msra.gmra.mrb[0].mxu0 %vm386_vm2, %v1231_v3 }
  0x27   : > { %930 = vmatprep.mubr.msk.bf16.mxu0 %vm1116_vm0, %v1115_v0  ;;  %929 = vmatpush3.bf16.msra.mxu0 %v596_v50  ;;  %p1005_p13 = pnand %p1004_p12, %p1201_p4 }
  0x29   : > { %p1006_p0 = pneg %p1005_p13 }
  0x2e   : > { %931 = vmatmul.mubr.msk.bf16.vlgmr.msra.gmra.mrb[4].mxu0 %vm386_vm2, %v1231_v3 }
  0xf6   : > { %v576_v0 = vpop.f32.mrb[0].mxu1 }
  0xf7   : > { %v926_v2 = vpop.f32.mrb[1].mxu1 }
  0xf9   : > { %v428_v5 = vpop.f32.mrb[0].mxu0 }
  0xfa   : > { %v435_v6 = vmul.f32 2.0, %v428_v5  ;;  %v920_v7 = vpop.f32.mrb[1].mxu0 }
  0xfb   : > { %v431_v8 = vpop.f32.mrb[2].mxu0 }
  0xfc   : > { %v443_v9 = vsub.f32 %v435_v6, %v887_v4  ;;  %v436_v10 = vmul.f32 2.0, %v431_v8  ;;  %v921_v11 = vpop.f32.mrb[3].mxu0  ;;  %v904_v8 = vpack.c.bf16 %v576_v0, %v576_v0 }
  0xfe   : > { %v444_v12 = vsub.f32 %v436_v10, %v887_v4  ;;  %v449_v13 = vsel %vm448_vm3, %v443_v9, -inf  ;;  %v579_v4 = vpop.f32.mrb[2].mxu1 }
  0xff   : > { %450 = vmax.xlane.f32.xlu0 %v449_v13  ;;  %v927_v6 = vpop.f32.mrb[3].mxu1  ;;  %v905_v10 = vpack.c.bf16 %v579_v4, %v579_v4 }
 0x100   : > { %v452_v14 = vsel %vm448_vm3, %v444_v12, -inf }
 0x101   : > { %v632_v1 = vpop.f32.mrb[4].mxu0 }
 0x102   : > { %v932_v3 = vpop.f32.mrb[5].mxu0 }
 0x103   : > { %453 = vmax.xlane.f32.xlu0 %v452_v14  ;;  %v635_v5 = vpop.f32.mrb[6].mxu0 }
 0x104   : > { %v933_v7 = vpop.f32.mrb[7].mxu0  ;;  %v907_v11 = vpack.c.bf16 %v635_v5, %v635_v5 }
 0x18c   : > { %v451_v18 = vpop.xlane.xlu0 %450 }
 0x18d   : > { %vm455_vm4 = vcmp.eq.f32.partialorder %v443_v9, %v451_v18 }
 0x18e   : > { %v457_v19 = vsel %vm455_vm4, %v1242_v17, 16.0 }
 0x18f   : > { %v459_v20 = vsel %vm448_vm3, %v457_v19, inf }
 0x190   : > { %460 = vmin.xlane.f32.xlu1 %v459_v20  ;;  %v454_v21 = vpop.xlane.xlu0 %453 }
 0x191   : > { %vm456_vm5 = vcmp.eq.f32.partialorder %v444_v12, %v454_v21 }
 0x192   : > { %v458_v22 = vsel %vm456_vm5, %v1242_v17, 16.0 }
 0x193   : > { %v462_v23 = vsel %vm448_vm3, %v458_v22, inf }
 0x194   : > { %463 = vmin.xlane.f32.xlu1 %v462_v23 }
 0x21d   : > { %v1248_v24 = vpop.xlane.xlu1 %460 }
 0x21e   : > { %vm465_vm6 = vcmp.eq.f32.partialorder %v1242_v17, %v1248_v24 }
 0x21f   : > { %v467_v25 = vsel %vm465_vm6, -inf, %v443_v9  ;;  %v906_v9 = vpack.c.bf16 %v632_v1, %v632_v1 }
 0x220   : > { %v469_v26 = vsel %vm448_vm3, %v467_v25, -inf }
 0x221   : > { %470 = vmax.xlane.f32.xlu0 %v469_v26  ;;  %v1253_v27 = vpop.xlane.xlu1 %463 }
 0x222   : > { %vm466_vm7 = vcmp.eq.f32.partialorder %v1242_v17, %v1253_v27 }
 0x223   : > { %v468_v28 = vsel %vm466_vm7, -inf, %v444_v12 }
 0x224   : > { %v472_v29 = vsel %vm448_vm3, %v468_v28, -inf }
 0x225   : > { %473 = vmax.xlane.f32.xlu1 %v472_v29 }
 0x2ae   : > { %v471_v30 = vpop.xlane.xlu0 %470 }
 0x2af   : > { %vm475_vm8 = vcmp.eq.f32.partialorder %v467_v25, %v471_v30 }
 0x2b0   : > { %v477_v31 = vsel %vm475_vm8, %v1242_v17, 16.0 }
 0x2b1   : > { %v479_v32 = vsel %vm448_vm3, %v477_v31, inf }
 0x2b2   : > { %v474_v33 = vpop.xlane.xlu1 %473  ;;  %480 = vmin.xlane.f32.xlu0 %v479_v32 }
 0x2b3   : > { %vm476_vm9 = vcmp.eq.f32.partialorder %v468_v28, %v474_v33 }
 0x2b4   : > { %v478_v34 = vsel %vm476_vm9, %v1242_v17, 16.0 }
 0x2b5   : > { %v482_v35 = vsel %vm448_vm3, %v478_v34, inf }
 0x2b6   : > { %483 = vmin.xlane.f32.xlu1 %v482_v35 }
 0x33f   : > { %v1262_v36 = vpop.xlane.xlu0 %480 }
 0x340   : > { %vm485_vm10 = vcmp.eq.f32.partialorder %v1242_v17, %v1262_v36 }
 0x341   : > { %v487_v37 = vsel %vm485_vm10, -inf, %v467_v25 }
 0x342   : > { %v489_v38 = vsel %vm448_vm3, %v487_v37, -inf }
 0x343   : > { %v1267_v39 = vpop.xlane.xlu1 %483  ;;  %490 = vmax.xlane.f32.xlu0 %v489_v38 }
 0x344   : > { %vm486_vm11 = vcmp.eq.f32.partialorder %v1242_v17, %v1267_v39 }
 0x345   : > { %v488_v40 = vsel %vm486_vm11, -inf, %v468_v28 }
 0x346   : > { %v492_v41 = vsel %vm448_vm3, %v488_v40, -inf }
 0x347   : > { %493 = vmax.xlane.f32.xlu1 %v492_v41 }
 0x3d0   : > { %v491_v42 = vpop.xlane.xlu0 %490 }
 0x3d1   : > { %vm495_vm12 = vcmp.eq.f32.partialorder %v487_v37, %v491_v42 }
 0x3d2   : > { %v497_v43 = vsel %vm495_vm12, %v1242_v17, 16.0 }
 0x3d3   : > { %v499_v44 = vsel %vm448_vm3, %v497_v43, inf }
 0x3d4   : > { %v494_v45 = vpop.xlane.xlu1 %493  ;;  %500 = vmin.xlane.f32.xlu0 %v499_v44 }
 0x3d5   : > { %vm496_vm13 = vcmp.eq.f32.partialorder %v488_v40, %v494_v45 }
 0x3d6   : > { %v498_v46 = vsel %vm496_vm13, %v1242_v17, 16.0 }
 0x3d7   : > { %v502_v47 = vsel %vm448_vm3, %v498_v46, inf }
 0x3d8   : > { %503 = vmin.xlane.f32.xlu1 %v502_v47 }
 0x461   : > { %v1288_v52 = vpop.xlane.xlu0 %500 }
 0x462   : > { %vm505_vm14 = vcmp.eq.f32.partialorder %v1242_v17, %v1288_v52 }
 0x463   : > { %v507_v53 = vsel %vm505_vm14, -inf, %v487_v37 }
 0x464   : > { %v509_v54 = vsel %vm448_vm3, %v507_v53, -inf }
 0x465   : > { %v1293_v55 = vpop.xlane.xlu1 %503  ;;  %510 = vmax.xlane.f32.xlu0 %v509_v54 }
 0x466   : > { %vm506_vm15 = vcmp.eq.f32.partialorder %v1242_v17, %v1293_v55 }
 0x467   : > { %v508_v56 = vsel %vm506_vm15, -inf, %v488_v40 }
 0x468   : > { %v512_v57 = vsel %vm448_vm3, %v508_v56, -inf }
 0x469   : > { %513 = vmax.xlane.f32.xlu1 %v512_v57 }
 0x4f2   : > { %v511_v58 = vpop.xlane.xlu0 %510 }
 0x4f3   : > { %vm515_vm0 = vcmp.eq.f32.partialorder %v507_v53, %v511_v58 }
 0x4f4   : > { %v517_v59 = vsel %vm515_vm0, %v1242_v17, 16.0 }
 0x4f5   : > { %v519_v60 = vsel %vm448_vm3, %v517_v59, inf }
 0x4f6   : > { %v514_v61 = vpop.xlane.xlu1 %513  ;;  %520 = vmin.xlane.f32.xlu0 %v519_v60 }
 0x4f7   : > { %vm516_vm1 = vcmp.eq.f32.partialorder %v508_v56, %v514_v61 }
 0x4f8   : > { %v518_v62 = vsel %vm516_vm1, %v1242_v17, 16.0 }
 0x4f9   : > { %v522_v63 = vsel %vm448_vm3, %v518_v62, inf  ;;  %vm591_vm3 = vcmask 125952  }
 0x4fa   : > { %523 = vmin.xlane.f32.xlu1 %v522_v63  ;;  %592 = vst.msk [vmem:[%s339_s21] sm:$0xf] %vm591_vm3, %v904_v8  ;;  %647 = vst.msk [vmem:[%s346_s23] sm:$0xf] %vm591_vm3, %v906_v9 }
 0x4fb   : > { %593 = vst.msk [vmem:[%s339_s21 + $0x4] sm:$0xf] %vm591_vm3, %v905_v10  ;;  %648 = vst.msk [vmem:[%s346_s23 + $0x4] sm:$0xf] %vm591_vm3, %v907_v11  ;;  %s1007_s21 = sshll.u32 %s1117_s20, 4  ;;  %s1008_s21 = int_to_ptr.vmem [resolvable:$false] %s1007_s21 }
 0x4fc   : > { %s1009_s23 = scalar_lea.vmem %s1008_s21, 256  ;;  %p1010_p1 = scmp.lt.s32.totalorder %s1306_s22, %s1008_s21 }
 0x4fd   : > { %p1011_p2 = scmp.lt.s32.totalorder %s1009_s23, %s1003_s18 }
 0x4ff   : > { %p1012_p3 = por %p1011_p2, %p1010_p1 }
 0x501   : > { %p1013_p5 = pnand %p1012_p3, %p1006_p0 }
 0x503   : > { %1016 = shalt.err (!%p1013_p5)
}
 0x504   : > { %s1017_s10 = scalar_lea.hbm %s1316_s16, 128  ;;  %s1021_s20 = scalar_lea.hbm %s1419_s6, 256 }
 0x505   : > { %p1018_p6 = scmp.ne.s32.totalorder %s1316_s16, %s1017_s10  ;;  %p1022_p10 = scmp.lt.u32.totalorder %s1316_s16, %s1419_s6 }
 0x506   : > { %p1023_p11 = scmp.lt.u32.totalorder %s1021_s20, %s1017_s10  ;;  %p1025_p13 = scmp.lt.u32.totalorder %s1017_s10, %s1316_s16 }
 0x507   : > { %p1019_p7 = pnand %p1018_p6, %p1201_p4 }
 0x508   : > { %p1024_p12 = por %p1023_p11, %p1022_p10 }
 0x509   : > { %p1020_p9 = pneg %p1019_p7 }
 0x50a   : > { %p1026_p0 = por %p1025_p13, %p1024_p12 }
 0x50c   : > { %p1027_p1 = pnand %p1026_p0, %p1020_p9 }
 0x50e   : > { %1030 = shalt.err (!%p1027_p1)
}
 0x50f   : > { %s1118_s18 = smov 64   ;;  %s1119_s8 = smov 4  }
 0x510   : > { %s1432_s17 = scalar_lea.sflag [#allocation3], %s1303_s19  ;;  %s1433_s23 = sshll.u32 %s1105_s27, 7 }
 0x511   : > { %938 = dma.vmem_to_hbm [thread:$0]  (%p1201_p4), %s1306_s22, 128, %s1316_s16, %s1432_s17, %s1118_s18, %s1118_s18, %s1119_s8  }
 0x512   : > { %s1350_s20 = scalar_lea.hbm %s1420_s7, %s1433_s23  ;;  %s664_s21 = scalar_lea.sflag [#allocation5], %s1303_s19 }
 0x513   : > { %s1031_s0 = scalar_lea.vmem %s1308_s30, 128  ;;  %s1120_s1 = smov [#allocation4]  }
 0x514   : > { %p1032_p2 = scmp.ne.s32.totalorder %s1308_s30, %s1031_s0  ;;  %s1035_s2 = sshll.u32 %s1120_s1, 4  ;;  %s1036_s2 = int_to_ptr.vmem [resolvable:$false] %s1035_s2 }
 0x515   : > { %s1037_s3 = scalar_lea.vmem %s1036_s2, 256  ;;  %p1038_p6 = scmp.lt.s32.totalorder %s1308_s30, %s1036_s2 }
 0x516   : > { %p1033_p3 = pnand %p1032_p2, %p1201_p4  ;;  %p1039_p7 = scmp.lt.s32.totalorder %s1037_s3, %s1031_s0 }
 0x518   : > { %p1034_p5 = pneg %p1033_p3  ;;  %p1040_p9 = por %p1039_p7, %p1038_p6 }
 0x51a   : > { %p1041_p10 = pnand %p1040_p9, %p1034_p5 }
 0x51c   : > { %1044 = shalt.err (!%p1041_p10)
}
 0x51d   : > { %s1045_s27 = scalar_lea.hbm %s1350_s20, 128  ;;  %s1049_s1 = scalar_lea.hbm %s1420_s7, 256 }
 0x51e   : > { %p1046_p11 = scmp.ne.s32.totalorder %s1350_s20, %s1045_s27  ;;  %p1050_p0 = scmp.lt.u32.totalorder %s1350_s20, %s1420_s7 }
 0x51f   : > { %p1051_p1 = scmp.lt.u32.totalorder %s1049_s1, %s1045_s27  ;;  %p1053_p3 = scmp.lt.u32.totalorder %s1045_s27, %s1350_s20 }
 0x520   : > { %p1047_p12 = pnand %p1046_p11, %p1201_p4 }
 0x521   : > { %p1052_p2 = por %p1051_p1, %p1050_p0 }
 0x522   : > { %p1048_p13 = pneg %p1047_p12 }
 0x523   : > { %p1054_p5 = por %p1053_p3, %p1052_p2 }
 0x525   : > { %p1055_p6 = pnand %p1054_p5, %p1048_p13 }
 0x527   : > { %1058 = shalt.err (!%p1055_p6)
}
 0x528   : > { %939 = dma.vmem_to_hbm [thread:$0]  (%p1201_p4), %s1308_s30, 128, %s1350_s20, %s664_s21, %s1118_s18, %s1118_s18, %s1119_s8   ;;  %vm525_vm4 = vcmask 7168   ;;  %vm528_vm5 = vcmask 15360   ;;  %vm531_vm6 = vcmask 23552  }
 0x529   : > { %v526_v12 = vsel %vm525_vm4, %v1248_v24, %v1262_v36  ;;  %s903_s0 = sshll.u32 %s1219_s15, 4  ;;  %v527_v17 = vsel %vm525_vm4, %v1253_v27, %v1267_v39 }
 0x52a   : > { %v529_v13 = vsel %vm528_vm5, %v526_v12, %v1288_v52  ;;  %s372_s19 = scalar_lea.vmem %s1418_s5, %s903_s0  ;;  %v530_v18 = vsel %vm528_vm5, %v527_v17, %v1293_v55 }
 0x583   : > { %v521_v14 = vpop.xlane.xlu0 %520 }
 0x584   : > { %v532_v15 = vsel %vm531_vm6, %v529_v13, %v521_v14 }
 0x585   : > { %v934_v16 = vtrunc.f32 %v532_v15 }
 0x587   : > { %v935_v19 = vcvt.f32.s32 %v934_v16  ;;  %v524_v20 = vpop.xlane.xlu1 %523 }
 0x588   : > { %v533_v21 = vsel %vm531_vm6, %v530_v18, %v524_v20 }
 0x589   : > { %536 = vst.msk [vmem:[%s372_s19] sm:$0xff] %vm386_vm2, %v935_v19  ;;  %v936_v22 = vtrunc.f32 %v533_v21 }
 0x58b   : > { %v937_v23 = vcvt.f32.s32 %v936_v22 }
 0x58d   : > { %537 = vst.msk [vmem:[%s372_s19 + $0x8] sm:$0xff] %vm386_vm2, %v937_v23 }
 0x58e PF: > { %p949_p4 = scmp.ge.s32.totalorder %s1113_s29, 2  ;;  %s728_s15 = sand.u32 1, %s1093_s24  }
 0x58f   : > { %s729_s30 = scalar_lea.sflag [#allocation3], %s728_s15 }
 0x590   : > { %p943_p7 = pnand %p949_p4, %p1208_p8 }
 0x592   : > { %1084 = dma.done.wait (!%p943_p7), %s729_s30, 128  }
 0x593   : > { %1086 = vsyncadd (!%p943_p7), %s729_s30, 4294967168  ;;  %s738_s18 = scalar_lea.sflag [#allocation5], %s728_s15 }
 0x594   : > { %1088 = dma.done.wait (!%p943_p7), %s738_s18, 128  }
 0x595   : > { %1090 = vsyncadd (!%p943_p7), %s738_s18, 4294967168  ;;  %s24_s29 = sadd.s32 1, %s1113_s29   ;;  %s1434_s24 = smov %s1097_s25 }
 0x596   : > { %p21_p9 = scmp.ge.s32.totalorder %s24_s29, 4   ;;  %s1435_s25 = smov %s1101_s26 }
 0x597   : > { %s1436_s26 = smov %s1214_s14  ;;  %s1437_s27 = smov %s1109_s28 }
 0x598   : > { %s1438_s28 = smov %s1440_s9  ;;  %23 = sbr.rel (!%p21_p9) target bundleno = 11 (0xb), region = 110 }
 0x59f   :  { %743 = vsyncpa [#allocation3], 1 }
 0x5a0   :  { %745 = vsyncpa [#allocation3 + $0x1], 1 }
 0x5a1   :  { %746 = vsyncpa [#allocation5], 1 }
 0x5a2   :  { %748 = vsyncpa [#allocation5 + $0x1], 1 }

</bundles_post_ra>
